<compile_context>
chip_gen: v7x
topology: tpu7x:2x2x1
jax: 0.10.0
libtpu: 0.0.40
codegen_flags: <defaults>
</compile_context>

<pallas_src>
import functools

import jax
import jax.numpy as jnp
from jax import lax
from jax.experimental import pallas as pl
from jax.experimental.pallas import tpu as pltpu


# ------------------------------- kernel ------------------------------------
def attention_kernel(x_ref, wqkv_ref, bqkv_ref, wproj_ref, bproj_ref,
                     bias_ref, o_ref, *, num_heads):
    """One grid step processes `bb` batch elements.

    x_ref     : (bb, T, C)  f32   activations
    wqkv_ref  : (C, 3C)     bf16  fused qkv weight, scale folded into q columns
    bqkv_ref  : (1, 3C)     f32   fused qkv bias,   scale folded into q part
    wproj_ref : (C, C)      bf16  output projection in (in_features, out_features)
    bproj_ref : (1, C)      f32
    bias_ref  : (T, T)      f32   additive mask bias (0 = attend, -1e30 = masked)
    o_ref     : (bb, T, C)  f32
    """
    bb, t, c = x_ref.shape
    h = num_heads
    hd = c // h

    # ---- fused QKV projection: one wide MXU dot for the whole block --------
    # (bb, T, C) f32 -> (bb*T, C) is an 8-row tile-aligned merge (free); cast
    # to bf16 only after the reshape.
    x2d = x_ref[...].reshape(bb * t, c).astype(jnp.bfloat16)
    qkv = jnp.dot(x2d, wqkv_ref[...],
                  preferred_element_type=jnp.float32) + bqkv_ref[...]   # (bb*T, 3C)
    qkv = qkv.reshape(bb, t, 3 * c)                                     # free split

    # ---- per-head extraction: static 8-lane slices + leading-dim concat ----
    # Flattened batch index n = head * bb + batch (consistent for q/k/v/o).
    def heads(off):
        return jnp.concatenate(
            [qkv[:, :, off + i * hd: off + (i + 1) * hd] for i in range(h)],
            axis=0)                                                     # (h*bb, T, hd)

    q = heads(0).astype(jnp.bfloat16)      # scale already folded into weights/bias
    k = heads(c).astype(jnp.bfloat16)
    v = heads(2 * c).astype(jnp.bfloat16)

    # ---- scores + softmax, batched over (head*batch) ------------------------
    qk_dims = (((2,), (2,)), ((0,), (0,)))          # 'ntd,nsd->nts' (implicit k^T)
    s = lax.dot_general(q, k, qk_dims, preferred_element_type=jnp.float32)
    s = s + bias_ref[...][None]                     # hoisted additive mask bias

    # f32 softmax; reciprocal goes to the otherwise-idle EUP slot.
    s = s - jnp.max(s, axis=-1, keepdims=True)
    p = jnp.exp(s)
    p = p * pl.reciprocal(jnp.sum(p, axis=-1, keepdims=True), approx=True)

    pv_dims = (((2,), (1,)), ((0,), (0,)))          # 'nts,nsd->ntd'
    o = lax.dot_general(p.astype(jnp.bfloat16), v, pv_dims,
                        preferred_element_type=jnp.float32)             # (h*bb, T, hd)

    # ---- head-combine (lane concat) + single output-projection dot ----------
    o = o.reshape(h, bb, t, hd)                                          # free split
    o_cat = jnp.concatenate([o[i] for i in range(h)], axis=-1)           # (bb, T, C)
    o2d = o_cat.reshape(bb * t, c).astype(jnp.bfloat16)                  # free merge
    y = jnp.dot(o2d, wproj_ref[...],
                preferred_element_type=jnp.float32) + bproj_ref[...]     # (bb*T, C)

    o_ref[...] = y.reshape(bb, t, c).astype(o_ref.dtype)


# ------------------------------ wrapper -------------------------------------
def _num_tensorcores() -> int:
    """2 on multi-TensorCore chips (v7x family), else 1 (v5e / v6e).
    NOTE: decided at Python trace time from the local device kind; under AOT
    compilation for a different target this only affects performance, never
    numerics."""
    try:
        kind = jax.devices()[0].device_kind.lower()
    except Exception:
        return 1
    return 2 if ("v7" in kind or "7x" in kind) else 1


def prepare_attention_params(wqkv, bqkv, wproj, bproj, mask, seq_len, num_heads):
    """One-time weight/mask restructuring. Call at model init, NOT per forward,
    so end-to-end latency reflects the kernel rather than layout plumbing.

    wqkv  : (3C, C)  nn.Linear layout (out_features, in_features)
    bqkv  : (3C,)
    wproj : (C, C)
    bproj : (C,)
    mask  : optional (T, T); nonzero = attend, zero = masked out
    """
    three_c, c = wqkv.shape
    assert three_c == 3 * c and c % num_heads == 0, "dim should be divisible by num_heads"
    hd = c // num_heads
    scale = hd ** -0.5

    # Fold the 1/sqrt(hd) score scale into the q columns (zero runtime cost).
    col_scale = jnp.concatenate(
        [jnp.full((c,), scale, jnp.float32), jnp.ones((2 * c,), jnp.float32)])
    w_fused = (wqkv.astype(jnp.float32).T * col_scale[None, :]).astype(jnp.bfloat16)  # (C, 3C)
    b_fused = (bqkv.astype(jnp.float32) * col_scale).reshape(1, 3 * c)                # (1, 3C)

    w_proj_t = wproj.astype(jnp.float32).T.astype(jnp.bfloat16)                       # (C, C)
    b_proj = bproj.astype(jnp.float32).reshape(1, c)                                  # (1, C)

    # Additive mask bias precomputed host-side. Large-finite -1e30 (not -inf /
    # -FLT_MAX). Fully-masked rows would differ from masked_fill semantics but
    # are unreachable with a causal mask.
    if mask is None:
        mask_bias = jnp.zeros((seq_len, seq_len), jnp.float32)
    else:
        mask_bias = jnp.where(mask.astype(jnp.float32) > 0.0, 0.0, -1e30).astype(jnp.float32)

    return dict(w_fused=w_fused, b_fused=b_fused, w_proj_t=w_proj_t,
                b_proj=b_proj, mask_bias=mask_bias, num_heads=num_heads)


def attention_forward(x, params):
    """x: (B, T, C) float32; params from prepare_attention_params."""
    B, T, C = x.shape
    H = params["num_heads"]

    # Batch elements per program: the whole batch in ONE grid step on
    # single-TC chips; exactly one grid step per TensorCore on v7x.
    ncores = _num_tensorcores()
    if ncores > 1 and B > 1:
        bb = -(-B // ncores)               # ceil(B / num_cores)
        if B % bb != 0:
            bb = 1                         # keep blocks uniform; still parallel over B
    else:
        bb = B

    kernel = functools.partial(attention_kernel, num_heads=H)
    const2 = lambda i: (0, 0)

    return pl.pallas_call(
        kernel,
        out_shape=jax.ShapeDtypeStruct((B, T, C), jnp.float32),
        grid=(B // bb,),
        in_specs=[
            pl.BlockSpec((bb, T, C), lambda i: (i, 0, 0)),     # x
            pl.BlockSpec((C, 3 * C), const2),                  # fused qkv weight
            pl.BlockSpec((1, 3 * C), const2),                  # fused qkv bias
            pl.BlockSpec((C, C), const2),                      # output projection
            pl.BlockSpec((1, C), const2),                      # output bias
            pl.BlockSpec((T, T), const2),                      # additive mask bias
        ],
        out_specs=pl.BlockSpec((bb, T, C), lambda i: (i, 0, 0)),
        compiler_params=pltpu.CompilerParams(
            dimension_semantics=("parallel",)),
    )(x, params["w_fused"], params["b_fused"], params["w_proj_t"],
      params["b_proj"], params["mask_bias"])


# -------------------------- parameter init / reference ----------------------
def variance_scaling(key, shape, scale=1.0):
    """fan_in variance scaling (stand-in for variance_scaling_); shape is
    (out_features, in_features)."""
    fan_in = shape[1]
    std = (scale / fan_in) ** 0.5
    return std * jax.random.normal(key, shape, dtype=jnp.float32)


def reference_forward(x, wqkv, bqkv, wproj, bproj, mask, num_heads):
    """Pure-JAX reference mirroring the PyTorch forward (with the same
    bf16-operand / f32-accumulation policy as the kernel)."""
    B, T, C = x.shape
    hd = C // num_heads
    scale = hd ** -0.5
    xb = x.astype(jnp.bfloat16)
    qkv = jnp.einsum("btc,jc->btj", xb, wqkv.astype(jnp.bfloat16),
                     preferred_element_type=jnp.float32) + bqkv
    qkv = qkv.reshape(B, T, 3, num_heads, hd).transpose(2, 0, 3, 1, 4)
    q, k, v = qkv[0], qkv[1], qkv[2]
    s = jnp.einsum("bhtd,bhsd->bhts", q.astype(jnp.bfloat16),
                   k.astype(jnp.bfloat16),
                   preferred_element_type=jnp.float32) * scale
    s = jnp.where(mask[None, None] > 0, s, -1e30)
    p = jax.nn.softmax(s, axis=-1)
    o = jnp.einsum("bhts,bhsd->bhtd", p.astype(jnp.bfloat16),
                   v.astype(jnp.bfloat16), preferred_element_type=jnp.float32)
    o = o.transpose(0, 2, 1, 3).reshape(B, T, C)
    return jnp.einsum("btj,cj->btc", o.astype(jnp.bfloat16),
                      wproj.astype(jnp.bfloat16),
                      preferred_element_type=jnp.float32) + bproj


# --------------------------------- main --------------------------------------
if __name__ == "__main__":
    B, T, C, H = 2, 8, 32, 4

    key = jax.random.PRNGKey(0)
    kx, kq, kp, kb1, kb2 = jax.random.split(key, 5)

    x = jax.random.normal(kx, (B, T, C), dtype=jnp.float32)

    # nn.Linear layout: weight is (out_features, in_features).
    wqkv = variance_scaling(kq, (3 * C, C), scale=1.0)
    wproj = variance_scaling(kp, (C, C), scale=1.0)
    # Module zero-inits biases; small nonzero biases here so the bias path is
    # actually exercised by the correctness check.
    bqkv = 0.1 * jax.random.normal(kb1, (3 * C,), dtype=jnp.float32)
    bproj = 0.1 * jax.random.normal(kb2, (C,), dtype=jnp.float32)

    mask = jnp.tril(jnp.ones((T, T), dtype=jnp.float32))   # causal mask

    # One-time prep (model init), then the forward call.
    params = prepare_attention_params(wqkv, bqkv, wproj, bproj, mask,
                                      seq_len=T, num_heads=H)
    out = attention_forward(x, params)
    out = jax.block_until_ready(out)

    ref = reference_forward(x, wqkv, bqkv, wproj, bproj, mask, H)
    assert out.shape == (B, T, C)
    max_err = float(jnp.max(jnp.abs(out - ref)))
    # Tolerance covers bf16 MXU operands, the scale folded into the bf16 qkv
    # weight, and the approx (EUP) softmax reciprocal.
    assert jnp.allclose(out, ref, atol=2.5e-2, rtol=2.5e-2), (
        f"mismatch vs reference (max |err| = {max_err})")

    print("KERNEL_OK")
</pallas_src>

<mosaic_0001>
module attributes {stable_mosaic.version = 11 : i64} {
  func.func @attention_kernel(%arg0: i32, %arg1: memref<2x8x32xf32, #tpu.memory_space<vmem>>, %arg2: memref<32x96xbf16, #tpu.memory_space<vmem>>, %arg3: memref<1x96xf32, #tpu.memory_space<vmem>>, %arg4: memref<32x32xbf16, #tpu.memory_space<vmem>>, %arg5: memref<1x32xf32, #tpu.memory_space<vmem>>, %arg6: memref<8x8xf32, #tpu.memory_space<vmem>>, %arg7: memref<2x8x32xf32, #tpu.memory_space<vmem>>) attributes {dimension_semantics = [#tpu.dimension_semantics<parallel>], iteration_bounds = array<i64: 1>, scalar_prefetch = 0 : i64, scratch_operands = 0 : i64, tpu.core_type = #tpu.core_type<tc>, window_params = [{transform_indices = @transform_0, window_bounds = array<i64: 2, 8, 32>}, {pipeline_mode = #tpu.pipeline_mode<synchronous>, transform_indices = @transform_1, window_bounds = array<i64: 32, 96>}, {pipeline_mode = #tpu.pipeline_mode<synchronous>, transform_indices = @transform_2, window_bounds = array<i64: 1, 96>}, {pipeline_mode = #tpu.pipeline_mode<synchronous>, transform_indices = @transform_3, window_bounds = array<i64: 32, 32>}, {pipeline_mode = #tpu.pipeline_mode<synchronous>, transform_indices = @transform_4, window_bounds = array<i64: 1, 32>}, {pipeline_mode = #tpu.pipeline_mode<synchronous>, transform_indices = @transform_5, window_bounds = array<i64: 8, 8>}, {transform_indices = @transform_6, window_bounds = array<i64: 2, 8, 32>}]} {
    %c0 = arith.constant 0 : index
    %c0_0 = arith.constant 0 : index
    %c0_1 = arith.constant 0 : index
    %0 = vector.load %arg1[%c0, %c0_0, %c0_1] : memref<2x8x32xf32, #tpu.memory_space<vmem>>, vector<2x8x32xf32>
    %1 = vector.shape_cast %0 : vector<2x8x32xf32> to vector<16x32xf32>
    %2 = arith.truncf %1 : vector<16x32xf32> to vector<16x32xbf16>
    %c0_2 = arith.constant 0 : index
    %c0_3 = arith.constant 0 : index
    %3 = vector.load %arg2[%c0_2, %c0_3] : memref<32x96xbf16, #tpu.memory_space<vmem>>, vector<32x96xbf16>
    %cst = arith.constant dense<0.000000e+00> : vector<16x96xf32>
    %4 = tpu.matmul %2, %3, %cst {dimension_numbers = #tpu.dot_dimension_numbers<[1], [0], [0], [1], [0, 0, 1, 1], [], []>} : vector<16x32xbf16>, vector<32x96xbf16>, vector<16x96xf32> -> vector<16x96xf32>
    %c0_4 = arith.constant 0 : index
    %c0_5 = arith.constant 0 : index
    %5 = vector.load %arg3[%c0_4, %c0_5] : memref<1x96xf32, #tpu.memory_space<vmem>>, vector<1x96xf32>
    %6 = vector.broadcast %5 : vector<1x96xf32> to vector<16x96xf32>
    %7 = arith.addf %4, %6 : vector<16x96xf32>
    %8 = vector.shape_cast %7 : vector<16x96xf32> to vector<2x8x96xf32>
    %9 = vector.extract_strided_slice %8 {offsets = [0, 0, 0], sizes = [2, 8, 8], strides = [1, 1, 1]} : vector<2x8x96xf32> to vector<2x8x8xf32>
    %10 = vector.extract_strided_slice %8 {offsets = [0, 0, 8], sizes = [2, 8, 8], strides = [1, 1, 1]} : vector<2x8x96xf32> to vector<2x8x8xf32>
    %11 = vector.extract_strided_slice %8 {offsets = [0, 0, 16], sizes = [2, 8, 8], strides = [1, 1, 1]} : vector<2x8x96xf32> to vector<2x8x8xf32>
    %12 = vector.extract_strided_slice %8 {offsets = [0, 0, 24], sizes = [2, 8, 8], strides = [1, 1, 1]} : vector<2x8x96xf32> to vector<2x8x8xf32>
    %13 = tpu.concatenate %9, %10, %11, %12 in 0 : vector<2x8x8xf32>, vector<2x8x8xf32>, vector<2x8x8xf32>, vector<2x8x8xf32> -> vector<8x8x8xf32>
    %14 = arith.truncf %13 : vector<8x8x8xf32> to vector<8x8x8xbf16>
    %15 = vector.extract_strided_slice %8 {offsets = [0, 0, 32], sizes = [2, 8, 8], strides = [1, 1, 1]} : vector<2x8x96xf32> to vector<2x8x8xf32>
    %16 = vector.extract_strided_slice %8 {offsets = [0, 0, 40], sizes = [2, 8, 8], strides = [1, 1, 1]} : vector<2x8x96xf32> to vector<2x8x8xf32>
    %17 = vector.extract_strided_slice %8 {offsets = [0, 0, 48], sizes = [2, 8, 8], strides = [1, 1, 1]} : vector<2x8x96xf32> to vector<2x8x8xf32>
    %18 = vector.extract_strided_slice %8 {offsets = [0, 0, 56], sizes = [2, 8, 8], strides = [1, 1, 1]} : vector<2x8x96xf32> to vector<2x8x8xf32>
    %19 = tpu.concatenate %15, %16, %17, %18 in 0 : vector<2x8x8xf32>, vector<2x8x8xf32>, vector<2x8x8xf32>, vector<2x8x8xf32> -> vector<8x8x8xf32>
    %20 = arith.truncf %19 : vector<8x8x8xf32> to vector<8x8x8xbf16>
    %21 = vector.extract_strided_slice %8 {offsets = [0, 0, 64], sizes = [2, 8, 8], strides = [1, 1, 1]} : vector<2x8x96xf32> to vector<2x8x8xf32>
    %22 = vector.extract_strided_slice %8 {offsets = [0, 0, 72], sizes = [2, 8, 8], strides = [1, 1, 1]} : vector<2x8x96xf32> to vector<2x8x8xf32>
    %23 = vector.extract_strided_slice %8 {offsets = [0, 0, 80], sizes = [2, 8, 8], strides = [1, 1, 1]} : vector<2x8x96xf32> to vector<2x8x8xf32>
    %24 = vector.extract_strided_slice %8 {offsets = [0, 0, 88], sizes = [2, 8, 8], strides = [1, 1, 1]} : vector<2x8x96xf32> to vector<2x8x8xf32>
    %25 = tpu.concatenate %21, %22, %23, %24 in 0 : vector<2x8x8xf32>, vector<2x8x8xf32>, vector<2x8x8xf32>, vector<2x8x8xf32> -> vector<8x8x8xf32>
    %26 = arith.truncf %25 : vector<8x8x8xf32> to vector<8x8x8xbf16>
    %cst_6 = arith.constant dense<0.000000e+00> : vector<8x8x8xf32>
    %27 = tpu.matmul %14, %20, %cst_6 {dimension_numbers = #tpu.dot_dimension_numbers<[2], [2], [1], [1], [0, 0, 0, 1, 1, 1], [0], [0]>} : vector<8x8x8xbf16>, vector<8x8x8xbf16>, vector<8x8x8xf32> -> vector<8x8x8xf32>
    %c0_7 = arith.constant 0 : index
    %c0_8 = arith.constant 0 : index
    %28 = vector.load %arg6[%c0_7, %c0_8] : memref<8x8xf32, #tpu.memory_space<vmem>>, vector<8x8xf32>
    %29 = vector.shape_cast %28 : vector<8x8xf32> to vector<1x8x8xf32>
    %30 = vector.broadcast %29 : vector<1x8x8xf32> to vector<8x8x8xf32>
    %31 = arith.addf %27, %30 : vector<8x8x8xf32>
    %cst_9 = arith.constant dense<0xFF800000> : vector<8x8xf32>
    %32 = vector.multi_reduction <maximumf>, %31, %cst_9 [2] : vector<8x8x8xf32> to vector<8x8xf32>
    %33 = vector.shape_cast %32 : vector<8x8xf32> to vector<8x8x1xf32>
    %34 = vector.broadcast %33 : vector<8x8x1xf32> to vector<8x8x8xf32>
    %35 = arith.subf %31, %34 : vector<8x8x8xf32>
    %36 = math.exp %35 : vector<8x8x8xf32>
    %cst_10 = arith.constant dense<0.000000e+00> : vector<8x8xf32>
    %37 = vector.multi_reduction <add>, %36, %cst_10 [2] : vector<8x8x8xf32> to vector<8x8xf32>
    %38 = vector.shape_cast %37 : vector<8x8xf32> to vector<8x8x1xf32>
    %39 = tpu.reciprocal %38 {approx = true} : vector<8x8x1xf32> -> vector<8x8x1xf32>
    %40 = vector.broadcast %39 : vector<8x8x1xf32> to vector<8x8x8xf32>
    %41 = arith.mulf %36, %40 : vector<8x8x8xf32>
    %42 = arith.truncf %41 : vector<8x8x8xf32> to vector<8x8x8xbf16>
    %cst_11 = arith.constant dense<0.000000e+00> : vector<8x8x8xf32>
    %43 = tpu.matmul %42, %26, %cst_11 {dimension_numbers = #tpu.dot_dimension_numbers<[2], [1], [1], [2], [0, 0, 0, 1, 1, 2], [0], [0]>} : vector<8x8x8xbf16>, vector<8x8x8xbf16>, vector<8x8x8xf32> -> vector<8x8x8xf32>
    %44 = vector.shape_cast %43 : vector<8x8x8xf32> to vector<4x2x8x8xf32>
    %45 = vector.extract_strided_slice %44 {offsets = [0, 0, 0, 0], sizes = [1, 2, 8, 8], strides = [1, 1, 1, 1]} : vector<4x2x8x8xf32> to vector<1x2x8x8xf32>
    %46 = vector.shape_cast %45 : vector<1x2x8x8xf32> to vector<2x8x8xf32>
    %47 = vector.extract_strided_slice %44 {offsets = [1, 0, 0, 0], sizes = [1, 2, 8, 8], strides = [1, 1, 1, 1]} : vector<4x2x8x8xf32> to vector<1x2x8x8xf32>
    %48 = vector.shape_cast %47 : vector<1x2x8x8xf32> to vector<2x8x8xf32>
    %49 = vector.extract_strided_slice %44 {offsets = [2, 0, 0, 0], sizes = [1, 2, 8, 8], strides = [1, 1, 1, 1]} : vector<4x2x8x8xf32> to vector<1x2x8x8xf32>
    %50 = vector.shape_cast %49 : vector<1x2x8x8xf32> to vector<2x8x8xf32>
    %51 = vector.extract_strided_slice %44 {offsets = [3, 0, 0, 0], sizes = [1, 2, 8, 8], strides = [1, 1, 1, 1]} : vector<4x2x8x8xf32> to vector<1x2x8x8xf32>
    %52 = vector.shape_cast %51 : vector<1x2x8x8xf32> to vector<2x8x8xf32>
    %53 = tpu.concatenate %46, %48, %50, %52 in 2 : vector<2x8x8xf32>, vector<2x8x8xf32>, vector<2x8x8xf32>, vector<2x8x8xf32> -> vector<2x8x32xf32>
    %54 = vector.shape_cast %53 : vector<2x8x32xf32> to vector<16x32xf32>
    %55 = arith.truncf %54 : vector<16x32xf32> to vector<16x32xbf16>
    %c0_12 = arith.constant 0 : index
    %c0_13 = arith.constant 0 : index
    %56 = vector.load %arg4[%c0_12, %c0_13] : memref<32x32xbf16, #tpu.memory_space<vmem>>, vector<32x32xbf16>
    %cst_14 = arith.constant dense<0.000000e+00> : vector<16x32xf32>
    %57 = tpu.matmul %55, %56, %cst_14 {dimension_numbers = #tpu.dot_dimension_numbers<[1], [0], [0], [1], [0, 0, 1, 1], [], []>} : vector<16x32xbf16>, vector<32x32xbf16>, vector<16x32xf32> -> vector<16x32xf32>
    %c0_15 = arith.constant 0 : index
    %c0_16 = arith.constant 0 : index
    %58 = vector.load %arg5[%c0_15, %c0_16] : memref<1x32xf32, #tpu.memory_space<vmem>>, vector<1x32xf32>
    %59 = vector.broadcast %58 : vector<1x32xf32> to vector<16x32xf32>
    %60 = arith.addf %57, %59 : vector<16x32xf32>
    %61 = vector.shape_cast %60 : vector<16x32xf32> to vector<2x8x32xf32>
    %c0_17 = arith.constant 0 : index
    %c0_18 = arith.constant 0 : index
    %c0_19 = arith.constant 0 : index
    %62 = vector.load %arg7[%c0_17, %c0_18, %c0_19] : memref<2x8x32xf32, #tpu.memory_space<vmem>>, vector<2x8x32xf32>
    tpu.vector_store %arg7[%c0_17, %c0_18, %c0_19], %61 {strides = array<i32>} : memref<2x8x32xf32, #tpu.memory_space<vmem>>, vector<2x8x32xf32>,
    return
  }
  func.func @transform_0(%arg0: i32) -> (i32, i32, i32) {
    %c0_i32 = arith.constant 0 : i32
    %c0_i32_0 = arith.constant 0 : i32
    %c0_i32_1 = arith.constant 0 : i32
    return %arg0, %c0_i32, %c0_i32_0 : i32, i32, i32
  }
  func.func @transform_1(%arg0: i32) -> (i32, i32) {
    %c0_i32 = arith.constant 0 : i32
    %c0_i32_0 = arith.constant 0 : i32
    %c0_i32_1 = arith.constant 0 : i32
    return %c0_i32, %c0_i32_0 : i32, i32
  }
  func.func @transform_2(%arg0: i32) -> (i32, i32) {
    %c0_i32 = arith.constant 0 : i32
    %c0_i32_0 = arith.constant 0 : i32
    %c0_i32_1 = arith.constant 0 : i32
    return %c0_i32, %c0_i32_0 : i32, i32
  }
  func.func @transform_3(%arg0: i32) -> (i32, i32) {
    %c0_i32 = arith.constant 0 : i32
    %c0_i32_0 = arith.constant 0 : i32
    %c0_i32_1 = arith.constant 0 : i32
    return %c0_i32, %c0_i32_0 : i32, i32
  }
  func.func @transform_4(%arg0: i32) -> (i32, i32) {
    %c0_i32 = arith.constant 0 : i32
    %c0_i32_0 = arith.constant 0 : i32
    %c0_i32_1 = arith.constant 0 : i32
    return %c0_i32, %c0_i32_0 : i32, i32
  }
  func.func @transform_5(%arg0: i32) -> (i32, i32) {
    %c0_i32 = arith.constant 0 : i32
    %c0_i32_0 = arith.constant 0 : i32
    %c0_i32_1 = arith.constant 0 : i32
    return %c0_i32, %c0_i32_0 : i32, i32
  }
  func.func @transform_6(%arg0: i32) -> (i32, i32, i32) {
    %c0_i32 = arith.constant 0 : i32
    %c0_i32_0 = arith.constant 0 : i32
    %c0_i32_1 = arith.constant 0 : i32
    return %arg0, %c0_i32, %c0_i32_0 : i32, i32, i32
  }
}

</mosaic_0001>

<bundles_post_ra>
// kernel: tpu_custom_call.1
= control target key start
LH: loop header
LB: loop body
LE: loop exit
PB: predicated region body
PF: predicated region fallthrough
CT: control target
= control target key end

     0   :  { %11 = vsyncpa [#allocation3], 0  ;;  %s1819_s0 = inlined_call_operand.hbm [shape: f32[2,8,32], index: 0, kind: input, shape index: {}]   ;;  %s1820_s1 = inlined_call_operand.hbm [shape: bf16[32,96], index: 1, kind: input, shape index: {}]   ;;  %s1821_s2 = inlined_call_operand.vmem [shape: f32[1,96], index: 2, kind: input, shape index: {}]   ;;  %s1822_s3 = inlined_call_operand.hbm [shape: bf16[32,32], index: 3, kind: input, shape index: {}]   ;;  %s1823_s4 = inlined_call_operand.vmem [shape: f32[1,32], index: 4, kind: input, shape index: {}]   ;;  %s1824_s5 = inlined_call_operand.vmem [shape: f32[8,8], index: 5, kind: input, shape index: {}]   ;;  %s1825_s6 = inlined_call_operand.hbm [shape: f32[2,8,32], index: 6, kind: output, shape index: {}]  }
   0x1   :  { %12 = vsyncpa [#allocation6], 0 }
   0x2   :  { %13 = vsyncpa [#allocation4], 0  ;;  %s1510_s21 = smov [#allocation5]   ;;  %s1416_s25 = scalar_lea.hbm %s1820_s1, 256 }
   0x3   :  { %s31_s22 = sshll.u32 %s1510_s21, 4  ;;  %p1417_p0 = scmp.ne.s32.totalorder %s1820_s1, %s1416_s25  ;;  %s32_s22 = int_to_ptr.vmem [resolvable:$true] %s31_s22 }
   0x4   :  { %p1420_p1 = scmp.lt.u32.totalorder %s1416_s25, %s1820_s1 }
   0x6   :  { %p1422_p2 = pnand %p1420_p1, %p1417_p0 }
   0x8   :  { %1425 = shalt.err (!%p1422_p2)
}
   0x9   :  { %s1426_s30 = scalar_lea.vmem %s32_s22, 256  ;;  %p1431_p4 = scmp.lt.s32.totalorder %s32_s22, %s32_s22 }
   0xa   :  { %p1427_p3 = scmp.ne.s32.totalorder %s32_s22, %s1426_s30  ;;  %p1432_p5 = scmp.lt.s32.totalorder %s1426_s30, %s1426_s30 }
   0xc   :  { %p1433_p6 = por %p1432_p5, %p1431_p4 }
   0xe   :  { %p1434_p7 = pnand %p1433_p6, %p1427_p3 }
  0x10   :  { %1437 = shalt.err (!%p1434_p7)
}
  0x11   :  { %s1511_s7 = smov 64   ;;  %s1512_s8 = smov 4  }
  0x12   :  { %37 = dma.hbm_to_vmem [thread:$0]  %s1820_s1, 256, %s32_s22, [#allocation6], %s1511_s7, %s1511_s7, %s1512_s8  }
  0x13   :  { %s1513_s11 = smov [#allocation2]   ;;  %s1438_s15 = scalar_lea.hbm %s1819_s0, 256 }
  0x14   :  { %s19_s12 = sshll.u32 %s1513_s11, 4  ;;  %p1439_p8 = scmp.ne.s32.totalorder %s1819_s0, %s1438_s15  ;;  %s20_s12 = int_to_ptr.vmem [resolvable:$true] %s19_s12 }
  0x15   :  { %p1442_p9 = scmp.lt.u32.totalorder %s1438_s15, %s1819_s0 }
  0x17   :  { %p1444_p10 = pnand %p1442_p9, %p1439_p8 }
  0x19   :  { %1447 = shalt.err (!%p1444_p10)
}
  0x1a   :  { %s1448_s20 = scalar_lea.vmem %s20_s12, 256  ;;  %p1453_p12 = scmp.lt.s32.totalorder %s20_s12, %s20_s12 }
  0x1b   :  { %p1449_p11 = scmp.ne.s32.totalorder %s20_s12, %s1448_s20  ;;  %p1454_p13 = scmp.lt.s32.totalorder %s1448_s20, %s1448_s20 }
  0x1d   :  { %p1455_p0 = por %p1454_p13, %p1453_p12 }
  0x1f   :  { %p1456_p1 = pnand %p1455_p0, %p1449_p11 }
  0x21   :  { %1459 = shalt.err (!%p1456_p1)
}
  0x22   :  { %s1514_s1 = smov 128   ;;  %s1515_s21 = smov 8  }
  0x23   :  { %25 = dma.hbm_to_vmem [thread:$0]  %s1819_s0, 256, %s20_s12, [#allocation3], %s1514_s1, %s1514_s1, %s1515_s21  }
  0x24   :  { %s1516_s24 = smov [#allocation7]   ;;  %s1460_s28 = scalar_lea.hbm %s1822_s3, 256 }
  0x25   :  { %s45_s25 = sshll.u32 %s1516_s24, 4  ;;  %p1461_p2 = scmp.ne.s32.totalorder %s1822_s3, %s1460_s28  ;;  %s46_s25 = int_to_ptr.vmem [resolvable:$true] %s45_s25 }
  0x26   :  { %p1464_p3 = scmp.lt.u32.totalorder %s1460_s28, %s1822_s3 }
  0x28   :  { %p1466_p4 = pnand %p1464_p3, %p1461_p2 }
  0x2a   :  { %1469 = shalt.err (!%p1466_p4)
}
  0x2b   :  { %s1470_s11 = scalar_lea.vmem %s46_s25, 256  ;;  %p1475_p6 = scmp.lt.s32.totalorder %s46_s25, %s46_s25 }
  0x2c   :  { %p1471_p5 = scmp.ne.s32.totalorder %s46_s25, %s1470_s11  ;;  %p1476_p7 = scmp.lt.s32.totalorder %s1470_s11, %s1470_s11 }
  0x2e   :  { %p1477_p8 = por %p1476_p7, %p1475_p6 }
  0x30   :  { %p1478_p9 = pnand %p1477_p8, %p1471_p5 }
  0x32   :  { %1481 = shalt.err (!%p1478_p9)
}
  0x33   :  { %51 = dma.hbm_to_vmem [thread:$0]  %s1822_s3, 256, %s46_s25, [#allocation6], %s1511_s7, %s1511_s7, %s1512_s8  }
  0x34   :  { %1504 = dma.done.wait [#allocation3], 256  }
  0x35   :  { %1505 = vsyncadd [#allocation3], 4294967040 }
  0x36   :  { %1506 = dma.done.wait [#allocation6], 512  }
  0x37   :  { %1507 = vsyncadd [#allocation6], 4294966784  ;;  %v1517_v0 = vmov 0.0   ;;  %vm1518_vm0 = vmmov 0   ;;  %v1380_v1 = vld [vmem:[#allocation5] sm:$0xff]   ;;  %v1381_v2 = vld [vmem:[#allocation5 + $0x8] sm:$0xff]  }
  0x38   :  { %1222 = vmatprep.subr.bf16.mxu0 %v1517_v0  ;;  %1226 = vmatprep.mubr.msk.bf16.mxu0 %vm1518_vm0, %v1517_v0  ;;  %v66_v3 = vld [vmem:[#allocation2] sm:$0xff]  ;;  %v67_v4 = vld [vmem:[#allocation2 + $0x8] sm:$0xff]  ;;  %vm92_vm1 = vcmask 261120   ;;  %s1519_s13 = smov 104   ;;  %s1520_s14 = smov 120   ;;  %vm169_vm2 = vcmask 64512  }
  0x39   :  { %1230 = vmatprep.subr.bf16.mxu1 %v1517_v0  ;;  %1232 = vmatprep.mubr.msk.bf16.mxu1 %vm1518_vm0, %v1517_v0  ;;  %v68_v5 = vpack.c.bf16 %v67_v4, %v66_v3  ;;  %v1160_v6 = vld [vmem:[%s1821_s2] ss:$0 sm:$0xff]  ;;  %s1521_s15 = smov 96   ;;  %s1522_s16 = smov 112   ;;  %vm660_vm3 = vcmask 1043456   ;;  %vm1066_vm4 = vcmask 130048  }
  0x3a   :  { %1223 = vmatpush3.bf16.msra.mxu0 %v1380_v1  ;;  %v165_v51 = vld [vmem:[%s1824_s5] sm:$0xff]  ;;  %s1523_s5 = smov 16   ;;  %vm1069_vm5 = vcmask 195584   ;;  %s1525_s20 = smov [#allocation8]  }
  0x3b   :  { %1224 = vmatprep.subr.bf16.mxu0 %v1517_v0  ;;  %s1147_s22 = sshll.u32 %s1525_s20, 4  ;;  %s1148_s22 = int_to_ptr.vmem [resolvable:$true] %s1147_s22 }
  0x3c   :  { %s1482_s23 = scalar_lea.vmem %s1148_s22, 256  ;;  %p1487_p11 = scmp.lt.s32.totalorder %s1148_s22, %s1148_s22 }
  0x3d   :  { %p1483_p10 = scmp.ne.s32.totalorder %s1148_s22, %s1482_s23  ;;  %p1488_p12 = scmp.lt.s32.totalorder %s1482_s23, %s1482_s23 }
  0x3e   :  { %1225 = vmatpush3.bf16.msra.mxu0 %v1381_v2 }
  0x3f   :  { %1236 = vmatprep.subr.bf16.mxu0 %v1517_v0  ;;  %p1489_p13 = por %p1488_p12, %p1487_p11 }
  0x41   :  { %1227 = vmatmul.mubr.msk.bf16.vlgmr.msra.gmra.mrb[0].mxu0 %vm92_vm1, %v68_v5  ;;  %p1490_p0 = pnand %p1489_p13, %p1483_p10 }
  0x42   :  { %1238 = vmatprep.mubr.msk.bf16.mxu0 %vm1518_vm0, %v1517_v0 }
 0x114   :  { %v130_v7 = vpop.f32.mrb[0].mxu0 }
 0x115   :  { %v1228_v8 = vpop.f32.mrb[1].mxu0  ;;  %v131_v10 = vadd.f32 %v1160_v6, %v130_v7 }
 0x116   :  { %v133_v9 = vpop.f32.mrb[2].mxu0 }
 0x117   :  { %v134_v11 = vadd.f32 %v1160_v6, %v133_v9  ;;  %v1229_v12 = vpop.f32.mrb[3].mxu0  ;;  %v157_v14 = vpack.c.bf16 %v131_v10, %v131_v10 }
 0x119   :  { %v1360_v13 = vpack.i.bf16 %v134_v11, %v131_v10  ;;  %v158_v15 = vpack.c.bf16 %v134_v11, %v134_v11 }
 0x11b   :  { %1361 = vrot.lane.b32.xlu1 %v1360_v13, %s1519_s13  ;;  %1351 = vrot.lane.b32.xlu0 %v1360_v13, %s1520_s14 }
 0x11f   :  { %167 = vrot.lane.b32.xlu1 %v157_v14, %s1521_s15  ;;  %1356 = vrot.lane.b32.xlu0 %v1360_v13, %s1522_s16 }
 0x123   :  { %217 = vrot.lane.b32.xlu0 %v158_v15, %s1521_s15 }
 0x18d   :  { %v1362_v16 = vpop.permute.xlu1 %1361  ;;  %v1352_v17 = vpop.permute.xlu0 %1351 }
 0x18e   :  { %v1354_v18 = vunpack.i.h.bf16 %v1352_v17  ;;  %v1353_v19 = vunpack.i.l.bf16 %v1352_v17  ;;  %v1363_v27 = vunpack.i.l.bf16 %v1362_v16  ;;  %v1364_v30 = vunpack.i.h.bf16 %v1362_v16 }
 0x190   :  { %v1622_v20 = vpack.c.bf16 %v1354_v18, %v1354_v18  ;;  %v1624_v21 = vpack.c.bf16 %v1353_v19, %v1353_v19  ;;  %v1641_v33 = vpack.c.bf16 %v1363_v27, %v1363_v27  ;;  %v1644_v34 = vpack.c.bf16 %v1364_v30, %v1364_v30 }
 0x191   :  { %v168_v22 = vpop.permute.xlu1 %167  ;;  %v1357_v23 = vpop.permute.xlu0 %1356 }
 0x192   :  { %v1359_v24 = vunpack.i.h.bf16 %v1357_v23  ;;  %v1358_v25 = vunpack.i.l.bf16 %v1357_v23  ;;  %266 = vrot.lane.b32.xlu1 %v1624_v21, %s1521_s15  ;;  %315 = vrot.lane.b32.xlu0 %v1622_v20, %s1521_s15  ;;  %v174_v26 = vsel %vm169_vm2, %v168_v22, 0 }
 0x193   :  { %1231 = vmatpush3.bf16.xpose.msra.mxu1 %v174_v26 }
 0x194   :  { %v1631_v28 = vpack.c.bf16 %v1359_v24, %v1359_v24  ;;  %v1633_v29 = vpack.c.bf16 %v1358_v25, %v1358_v25  ;;  %1242 = vmatprep.subr.bf16.mxu1 %v1517_v0 }
 0x195   :  { %v218_v31 = vpop.permute.xlu0 %217 }
 0x196   :  { %v223_v32 = vsel %vm169_vm2, %v218_v31, 0  ;;  %364 = vrot.lane.b32.xlu1 %v1633_v29, %s1521_s15  ;;  %413 = vrot.lane.b32.xlu0 %v1631_v28, %s1521_s15 }
 0x197   :  { %1237 = vmatpush3.bf16.xpose.msra.mxu0 %v223_v32 }
 0x198   :  { %1248 = vmatprep.subr.bf16.mxu0 %v1517_v0 }
 0x19a   :  { %1233 = vmatmul.mubr.msk.bf16.vlgmr.msra.gmra.mrb[0].mxu1 %vm169_vm2, %v157_v14  ;;  %462 = vrot.lane.b32.xlu1 %v1641_v33, %s1521_s15 }
 0x19b   :  { %511 = vrot.lane.b32.xlu0 %v1644_v34, %s1521_s15  ;;  %1244 = vmatprep.mubr.msk.bf16.mxu1 %vm1518_vm0, %v1517_v0 }
 0x19e   :  { %704 = vrot.lane.b32.xlu1 %v158_v15, %s1511_s7  ;;  %1239 = vmatmul.mubr.msk.bf16.vlgmr.msra.gmra.mrb[4].mxu0 %vm169_vm2, %v158_v15 }
 0x19f   :  { %655 = vrot.lane.b32.xlu0 %v157_v14, %s1511_s7  ;;  %1250 = vmatprep.mubr.msk.bf16.mxu0 %vm1518_vm0, %v1517_v0 }
 0x204   :  { %v267_v35 = vpop.permute.xlu1 %266  ;;  %v316_v36 = vpop.permute.xlu0 %315 }
 0x205   :  { %v272_v37 = vsel %vm169_vm2, %v267_v35, 0  ;;  %v321_v38 = vsel %vm169_vm2, %v316_v36, 0 }
 0x206   :  { %1243 = vmatpush3.bf16.xpose.msra.mxu1 %v272_v37  ;;  %1249 = vmatpush3.bf16.xpose.msra.mxu0 %v321_v38 }
 0x207   :  { %1254 = vmatprep.subr.bf16.mxu1 %v1517_v0  ;;  %1260 = vmatprep.subr.bf16.mxu0 %v1517_v0 }
 0x208   :  { %v365_v39 = vpop.permute.xlu1 %364  ;;  %v414_v40 = vpop.permute.xlu0 %413 }
 0x209   :  { %v370_v41 = vsel %vm169_vm2, %v365_v39, 0  ;;  %v419_v42 = vsel %vm169_vm2, %v414_v40, 0 }
 0x20c   :  { %v463_v43 = vpop.permute.xlu1 %462 }
 0x20d   :  { %1245 = vmatmul.mubr.msk.bf16.vlgmr.msra.gmra.mrb[4].mxu1 %vm169_vm2, %v1624_v21  ;;  %1251 = vmatmul.mubr.msk.bf16.vlgmr.msra.gmra.mrb[8].mxu0 %vm169_vm2, %v1622_v20  ;;  %v512_v44 = vpop.permute.xlu0 %511  ;;  %v468_v45 = vsel %vm169_vm2, %v463_v43, 0 }
 0x20e   :  { %1255 = vmatpush3.bf16.xpose.msra.mxu1 %v370_v41  ;;  %1261 = vmatpush3.bf16.xpose.msra.mxu0 %v419_v42  ;;  %v517_v46 = vsel %vm169_vm2, %v512_v44, 0 }
 0x20f   :  { %1256 = vmatprep.mubr.msk.bf16.mxu1 %vm1518_vm0, %v1517_v0  ;;  %1262 = vmatprep.mubr.msk.bf16.mxu0 %vm1518_vm0, %v1517_v0 }
 0x210   :  { %1266 = vmatprep.subr.bf16.mxu1 %v1517_v0  ;;  %1272 = vmatprep.subr.bf16.mxu0 %v1517_v0  ;;  %v705_v47 = vpop.permute.xlu1 %704 }
 0x211   :  { %v656_v48 = vpop.permute.xlu0 %655  ;;  %v710_v49 = vsel %vm660_vm3, %v705_v47, 0 }
 0x212   :  { %v662_v50 = vsel %vm660_vm3, %v656_v48, 0 }
 0x215   :  { %1257 = vmatmul.mubr.msk.bf16.vlgmr.msra.gmra.mrb[8].mxu1 %vm169_vm2, %v1633_v29  ;;  %1263 = vmatmul.mubr.msk.bf16.vlgmr.msra.gmra.mrb[12].mxu0 %vm169_vm2, %v1631_v28 }
 0x216   :  { %1267 = vmatpush3.bf16.xpose.msra.mxu1 %v468_v45  ;;  %1273 = vmatpush3.bf16.xpose.msra.mxu0 %v517_v46 }
 0x217   :  { %1268 = vmatprep.mubr.msk.bf16.mxu1 %vm1518_vm0, %v1517_v0  ;;  %1274 = vmatprep.mubr.msk.bf16.mxu0 %vm1518_vm0, %v1517_v0 }
 0x218   :  { %1278 = vmatprep.subr.bf16.mxu1 %v1517_v0  ;;  %1284 = vmatprep.subr.bf16.mxu0 %v1517_v0 }
 0x21d   :  { %1269 = vmatmul.mubr.msk.bf16.vlgmr.msra.gmra.mrb[12].mxu1 %vm169_vm2, %v1641_v33  ;;  %1275 = vmatmul.mubr.msk.bf16.vlgmr.msra.gmra.mrb[16].mxu0 %vm169_vm2, %v1644_v34 }
 0x21e   :  { %1279 = vmatpush3.bf16.msra.mxu1 %v662_v50  ;;  %1285 = vmatpush3.bf16.msra.mxu0 %v710_v49 }
 0x21f   :  { %1280 = vmatprep.mubr.msk.bf16.mxu1 %vm1518_vm0, %v1517_v0  ;;  %1286 = vmatprep.mubr.msk.bf16.mxu0 %vm1518_vm0, %v1517_v0 }
 0x220   :  { %1290 = vmatprep.subr.bf16.mxu1 %v1517_v0  ;;  %1296 = vmatprep.subr.bf16.mxu0 %v1517_v0 }
 0x26d   :  { %v210_v52 = vpop.f32.mrb[0].mxu1 }
 0x26e   :  { %v211_v53 = vadd.f32 %v210_v52, %v165_v51  ;;  %v1234_v54 = vpop.f32.mrb[1].mxu1 }
 0x26f   :  { %v213_v55 = vpop.f32.mrb[2].mxu1 }
 0x270   :  { %v1235_v56 = vpop.f32.mrb[3].mxu1  ;;  %v559_v57 = vsel %vm169_vm2, %v211_v53, -inf }
 0x271   :  { %560 = vmax.xlane.f32.xlu1 %v559_v57  ;;  %v259_v58 = vpop.f32.mrb[4].mxu0 }
 0x272   :  { %v260_v59 = vadd.f32 %v259_v58, %v165_v51  ;;  %v1240_v60 = vpop.f32.mrb[5].mxu0 }
 0x273   :  { %v262_v61 = vpop.f32.mrb[6].mxu0 }
 0x274   :  { %v1241_v62 = vpop.f32.mrb[7].mxu0  ;;  %v562_v63 = vsel %vm169_vm2, %v260_v59, -inf }
 0x275   :  { %563 = vmax.xlane.f32.xlu0 %v562_v63 }
 0x2e0   :  { %v308_v1 = vpop.f32.mrb[4].mxu1  ;;  %v357_v2 = vpop.f32.mrb[8].mxu0 }
 0x2e1   :  { %v309_v3 = vadd.f32 %v308_v1, %v165_v51  ;;  %v358_v4 = vadd.f32 %v357_v2, %v165_v51  ;;  %v1246_v5 = vpop.f32.mrb[5].mxu1  ;;  %v1252_v6 = vpop.f32.mrb[9].mxu0 }
 0x2e2   :  { %v311_v7 = vpop.f32.mrb[6].mxu1  ;;  %v360_v8 = vpop.f32.mrb[10].mxu0 }
 0x2e3   :  { %v1247_v9 = vpop.f32.mrb[7].mxu1  ;;  %v1253_v10 = vpop.f32.mrb[11].mxu0  ;;  %v565_v11 = vsel %vm169_vm2, %v309_v3, -inf  ;;  %v568_v12 = vsel %vm169_vm2, %v358_v4, -inf }
 0x2e4   :  { %566 = vmax.xlane.f32.xlu0 %v565_v11  ;;  %569 = vmax.xlane.f32.xlu1 %v568_v12 }
 0x2e8   :  { %v406_v13 = vpop.f32.mrb[8].mxu1  ;;  %v455_v14 = vpop.f32.mrb[12].mxu0 }
 0x2e9   :  { %v1705_v15 = vadd.f32 %v406_v13, %v165_v51  ;;  %v456_v16 = vadd.f32 %v455_v14, %v165_v51  ;;  %v1258_v17 = vpop.f32.mrb[9].mxu1  ;;  %v1264_v18 = vpop.f32.mrb[13].mxu0 }
 0x2ea   :  { %v409_v19 = vpop.f32.mrb[10].mxu1  ;;  %v458_v22 = vpop.f32.mrb[14].mxu0 }
 0x2eb   :  { %v1259_v23 = vpop.f32.mrb[11].mxu1  ;;  %v1265_v24 = vpop.f32.mrb[15].mxu0  ;;  %v571_v25 = vsel %vm169_vm2, %v1705_v15, -inf  ;;  %v574_v26 = vsel %vm169_vm2, %v456_v16, -inf }
 0x2ec   :  { %572 = vmax.xlane.f32.xlu0 %v571_v25  ;;  %575 = vmax.xlane.f32.xlu1 %v574_v26 }
 0x2f0   :  { %v504_v27 = vpop.f32.mrb[12].mxu1  ;;  %v553_v30 = vpop.f32.mrb[16].mxu0 }
 0x2f1   :  { %v1710_v31 = vadd.f32 %v504_v27, %v165_v51  ;;  %v554_v32 = vadd.f32 %v553_v30, %v165_v51  ;;  %v1270_v35 = vpop.f32.mrb[13].mxu1  ;;  %v1276_v36 = vpop.f32.mrb[17].mxu0 }
 0x2f2   :  { %v507_v37 = vpop.f32.mrb[14].mxu1  ;;  %v556_v38 = vpop.f32.mrb[18].mxu0 }
 0x2f3   :  { %v1271_v39 = vpop.f32.mrb[15].mxu1  ;;  %v1277_v40 = vpop.f32.mrb[19].mxu0  ;;  %v577_v41 = vsel %vm169_vm2, %v1710_v31, -inf  ;;  %v580_v42 = vsel %vm169_vm2, %v554_v32, -inf }
 0x2f4   :  { %578 = vmax.xlane.f32.xlu0 %v577_v41  ;;  %581 = vmax.xlane.f32.xlu1 %v580_v42 }
 0x2fe   :  { %v561_v43 = vpop.xlane.xlu1 %560 }
 0x2ff   :  { %v583_v45 = vsub.f32 %v211_v53, %v561_v43 }
 0x301   :  { %v591_v47 = vmul.f32 1.442695, %v583_v45 }
 0x302   :  { %v564_v44 = vpop.xlane.xlu0 %563 }
 0x303   :  { %v584_v46 = vsub.f32 %v260_v59, %v564_v44  ;;  %1384 = vpow2.f32 %v591_v47 }
 0x305   :  { %752 = vrot.lane.b32.xlu1 %v1624_v21, %s1511_s7  ;;  %v593_v48 = vmul.f32 1.442695, %v584_v46 }
 0x307   :  { %1386 = vpow2.f32 %v593_v48 }
 0x30a   :  { %800 = vrot.lane.b32.xlu0 %v1622_v20, %s1511_s7 }
 0x30d   :  { %v1385_v49 = vpop.eup %1384 }
 0x30e   :  { %v607_v51 = vsel %vm169_vm2, %v1385_v49, 0.0 }
 0x311   :  { %v1387_v50 = vpop.eup %1386 }
 0x312   :  { %v610_v52 = vsel %vm169_vm2, %v1387_v50, 0.0 }
 0x329   :  { %608 = vadd.xlane.f32.xlu0 %v607_v51  ;;  %611 = vadd.xlane.f32.xlu1 %v610_v52 }
 0x33a   :  { %848 = vrot.lane.b32.xlu1 %v1633_v29, %s1511_s7 }
 0x371   :  { %v567_v20 = vpop.xlane.xlu0 %566  ;;  %v570_v21 = vpop.xlane.xlu1 %569 }
 0x372   :  { %v585_v54 = vsub.f32 %v309_v3, %v567_v20  ;;  %v586_v53 = vsub.f32 %v358_v4, %v570_v21 }
 0x374   :  { %v595_v55 = vmul.f32 1.442695, %v585_v54  ;;  %v597_v56 = vmul.f32 1.442695, %v586_v53 }
 0x376   :  { %1388 = vpow2.f32 %v595_v55 }
 0x377   :  { %1390 = vpow2.f32 %v597_v56 }
 0x379   :  { %v576_v57 = vpop.xlane.xlu1 %575  ;;  %v573_v7 = vpop.xlane.xlu0 %572 }
 0x37a   :  { %v588_v58 = vsub.f32 %v456_v16, %v576_v57  ;;  %v587_v8 = vsub.f32 %v1705_v15, %v573_v7 }
 0x37c   :  { %v601_v59 = vmul.f32 1.442695, %v588_v58  ;;  %v599_v10 = vmul.f32 1.442695, %v587_v8 }
 0x37e   :  { %1392 = vpow2.f32 %v601_v59 }
 0x380   :  { %v1723_v60 = vpop.eup %1388 }
 0x381   :  { %v1725_v61 = vpop.eup %1390  ;;  %v582_v62 = vpop.xlane.xlu1 %581  ;;  %v613_v29 = vsel %vm169_vm2, %v1723_v60, 0.0 }
 0x382   :  { %v590_v63 = vsub.f32 %v554_v32, %v582_v62  ;;  %614 = vadd.xlane.f32.xlu0 %v613_v29  ;;  %v616_v1 = vsel %vm169_vm2, %v1725_v61, 0.0  ;;  %v579_v9 = vpop.xlane.xlu0 %578 }
 0x383   :  { %617 = vadd.xlane.f32.xlu1 %v616_v1  ;;  %v589_v11 = vsub.f32 %v1710_v31, %v579_v9 }
 0x384   :  { %v605_v2 = vmul.f32 1.442695, %v590_v63 }
 0x385   :  { %v603_v12 = vmul.f32 1.442695, %v589_v11  ;;  %v753_v14 = vpop.permute.xlu1 %752 }
 0x386   :  { %1394 = vpow2.f32 %v605_v2  ;;  %v801_v13 = vpop.permute.xlu0 %800  ;;  %v758_v27 = vsel %vm660_vm3, %v753_v14, 0 }
 0x387   :  { %1396 = vpow2.f32 %v599_v10  ;;  %v806_v30 = vsel %vm660_vm3, %v801_v13, 0 }
 0x388   :  { %v1731_v3 = vpop.eup %1392  ;;  %1398 = vpow2.f32 %v603_v12 }
 0x389   :  { %v622_v4 = vsel %vm169_vm2, %v1731_v3, 0.0 }
 0x38a   :  { %623 = vadd.xlane.f32.xlu1 %v622_v4 }
 0x390   :  { %v1735_v5 = vpop.eup %1394 }
 0x391   :  { %v628_v6 = vsel %vm169_vm2, %v1735_v5, 0.0  ;;  %v1745_v16 = vpop.eup %1396 }
 0x392   :  { %629 = vadd.xlane.f32.xlu1 %v628_v6  ;;  %v1749_v15 = vpop.eup %1398 }
 0x398   :  { %896 = vrot.lane.b32.xlu0 %v1631_v28, %s1511_s7  ;;  %v619_v28 = vsel %vm169_vm2, %v1745_v16, 0.0 }
 0x3a3   :  { %944 = vrot.lane.b32.xlu1 %v1641_v33, %s1511_s7  ;;  %v625_v33 = vsel %vm169_vm2, %v1749_v15, 0.0 }
 0x3b6   :  { %v609_v17 = vpop.xlane.xlu0 %608  ;;  %v612_v18 = vpop.xlane.xlu1 %611 }
 0x3b7   :  { %1400 = vrcp.f32 %v609_v17  ;;  %620 = vadd.xlane.f32.xlu0 %v619_v28 }
 0x3b8   :  { %1402 = vrcp.f32 %v612_v18 }
 0x3ba   :  { %v849_v31 = vpop.permute.xlu1 %848 }
 0x3bb   :  { %626 = vadd.xlane.f32.xlu0 %v625_v33  ;;  %v854_v44 = vsel %vm660_vm3, %v849_v31, 0 }
 0x3c1   :  { %v1401_v19 = vpop.eup %1400 }
 0x3c2   :  { %v1403_v22 = vpop.eup %1402  ;;  %v639_v23 = vmul.f32 %v1401_v19, %v1385_v49 }
 0x3c3   :  { %v640_v24 = vmul.f32 %v1403_v22, %v1387_v50 }
 0x3c4   :  { %v647_v25 = vpack.c.bf16 %v639_v23, %v639_v23 }
 0x3c5   :  { %v648_v26 = vpack.c.bf16 %v640_v24, %v640_v24 }
 0x3c6   :  { %1281 = vmatmul.mubr.msk.bf16.vlgmr.msra.gmra.mrb[16].mxu1 %vm169_vm2, %v647_v25  ;;  %v1383_v25 = vld [vmem:[#allocation7 + $0x8] sm:$0xff]  }
 0x3c7   :  { %1287 = vmatmul.mubr.msk.bf16.vlgmr.msra.gmra.mrb[20].mxu0 %vm169_vm2, %v648_v26  ;;  %1291 = vmatpush3.bf16.msra.mxu1 %v758_v27 }
 0x3c8   :  { %1297 = vmatpush3.bf16.msra.mxu0 %v806_v30  ;;  %1292 = vmatprep.mubr.msk.bf16.mxu1 %vm1518_vm0, %v1517_v0 }
 0x3c9   :  { %1298 = vmatprep.mubr.msk.bf16.mxu0 %vm1518_vm0, %v1517_v0  ;;  %1302 = vmatprep.subr.bf16.mxu1 %v1517_v0 }
 0x3ca   :  { %1308 = vmatprep.subr.bf16.mxu0 %v1517_v0 }
 0x3d1   :  { %992 = vrot.lane.b32.xlu0 %v1644_v34, %s1511_s7  ;;  %s1524_s7 = smov 24  }
 0x40f   :  { %v615_v32 = vpop.xlane.xlu0 %614 }
 0x410   :  { %1404 = vrcp.f32 %v615_v32  ;;  %v618_v35 = vpop.xlane.xlu1 %617 }
 0x411   :  { %1406 = vrcp.f32 %v618_v35 }
 0x413   :  { %v897_v41 = vpop.permute.xlu0 %896 }
 0x414   :  { %v902_v34 = vsel %vm660_vm3, %v897_v41, 0 }
 0x417   :  { %v624_v36 = vpop.xlane.xlu1 %623 }
 0x418   :  { %1408 = vrcp.f32 %v624_v36 }
 0x41a   :  { %v1405_v37 = vpop.eup %1404 }
 0x41b   :  { %v1407_v38 = vpop.eup %1406  ;;  %v641_v39 = vmul.f32 %v1405_v37, %v1723_v60 }
 0x41c   :  { %v642_v40 = vmul.f32 %v1407_v38, %v1725_v61 }
 0x41d   :  { %v649_v42 = vpack.c.bf16 %v641_v39, %v641_v39 }
 0x41e   :  { %v650_v43 = vpack.c.bf16 %v642_v40, %v642_v40 }
 0x41f   :  { %1293 = vmatmul.mubr.msk.bf16.vlgmr.msra.gmra.mrb[20].mxu1 %vm169_vm2, %v649_v42  ;;  %v630_v48 = vpop.xlane.xlu1 %629 }
 0x420   :  { %1299 = vmatmul.mubr.msk.bf16.vlgmr.msra.gmra.mrb[24].mxu0 %vm169_vm2, %v650_v43  ;;  %1303 = vmatpush3.bf16.msra.mxu1 %v854_v44  ;;  %1410 = vrcp.f32 %v630_v48 }
 0x421   :  { %1309 = vmatpush3.bf16.msra.mxu0 %v902_v34  ;;  %1310 = vmatprep.mubr.msk.bf16.mxu0 %vm1518_vm0, %v1517_v0 }
 0x422   :  { %1320 = vmatprep.subr.bf16.mxu0 %v1517_v0  ;;  %1304 = vmatprep.mubr.msk.bf16.mxu1 %vm1518_vm0, %v1517_v0  ;;  %v1409_v45 = vpop.eup %1408 }
 0x423   :  { %1314 = vmatprep.subr.bf16.mxu1 %v1517_v0  ;;  %v644_v46 = vmul.f32 %v1409_v45, %v1731_v3  ;;  %v945_v56 = vpop.permute.xlu1 %944 }
 0x424   :  { %v950_v59 = vsel %vm660_vm3, %v945_v56, 0 }
 0x425   :  { %v652_v47 = vpack.c.bf16 %v644_v46, %v644_v46 }
 0x428   :  { %1311 = vmatmul.mubr.msk.bf16.vlgmr.msra.gmra.mrb[28].mxu0 %vm169_vm2, %v652_v47 }
 0x429   :  { %1322 = vmatprep.mubr.msk.bf16.mxu0 %vm1518_vm0, %v1517_v0 }
 0x42a   :  { %v1411_v50 = vpop.eup %1410 }
 0x42b   :  { %v646_v52 = vmul.f32 %v1411_v50, %v1735_v5 }
 0x42d   :  { %v654_v53 = vpack.c.bf16 %v646_v52, %v646_v52 }
 0x444   :  { %v621_v49 = vpop.xlane.xlu0 %620 }
 0x445   :  { %1412 = vrcp.f32 %v621_v49 }
 0x448   :  { %v627_v51 = vpop.xlane.xlu0 %626 }
 0x449   :  { %1414 = vrcp.f32 %v627_v51 }
 0x44c   :  { %v993_v20 = vpop.permute.xlu0 %992 }
 0x44d   :  { %v998_v21 = vsel %vm660_vm3, %v993_v20, 0  ;;  %v1180_v20 = vld [vmem:[%s1823_s4] ss:$0 sm:$0xff] }
 0x44e   :  { %1321 = vmatpush3.bf16.msra.mxu0 %v998_v21 }
 0x44f   :  { %v1413_v54 = vpop.eup %1412 }
 0x450   :  { %v643_v55 = vmul.f32 %v1413_v54, %v1745_v16 }
 0x451   :  { %1323 = vmatmul.mubr.msk.bf16.vlgmr.msra.gmra.mrb[32].mxu0 %vm169_vm2, %v654_v53 }
 0x452   :  { %v651_v57 = vpack.c.bf16 %v643_v55, %v643_v55 }
 0x453   :  { %v1415_v58 = vpop.eup %1414 }
 0x454   :  { %1305 = vmatmul.mubr.msk.bf16.vlgmr.msra.gmra.mrb[24].mxu1 %vm169_vm2, %v651_v57  ;;  %v645_v60 = vmul.f32 %v1415_v58, %v1749_v15  ;;  %v1382_v15 = vld [vmem:[#allocation7] sm:$0xff]  }
 0x455   :  { %1315 = vmatpush3.bf16.msra.mxu1 %v950_v59  ;;  %1316 = vmatprep.mubr.msk.bf16.mxu1 %vm1518_vm0, %v1517_v0 }
 0x456   :  { %1326 = vmatprep.subr.bf16.mxu1 %v1517_v0  ;;  %v653_v61 = vpack.c.bf16 %v645_v60, %v645_v60 }
 0x45c   :  { %1317 = vmatmul.mubr.msk.bf16.vlgmr.msra.gmra.mrb[28].mxu1 %vm169_vm2, %v653_v61 }
 0x45d   :  { %1330 = vmatprep.mubr.msk.bf16.mxu1 %vm1518_vm0, %v1517_v0  ;;  %1327 = vmatpush3.bf16.msra.mxu1 %v1382_v15 }
 0x45e   :  { %1328 = vmatprep.subr.bf16.mxu1 %v1517_v0 }
 0x461   :  { %1329 = vmatpush3.bf16.msra.mxu1 %v1383_v25 }
 0x499   :  { %v698_v62 = vpop.f32.mrb[16].mxu1 }
 0x49a   :  { %v746_v29 = vpop.f32.mrb[20].mxu0  ;;  %v1282_v63 = vpop.f32.mrb[17].mxu1 }
 0x49b   :  { %v1288_v1 = vpop.f32.mrb[21].mxu0  ;;  %v701_v2 = vpop.f32.mrb[18].mxu1 }
 0x49c   :  { %v749_v3 = vpop.f32.mrb[22].mxu0  ;;  %v1283_v4 = vpop.f32.mrb[19].mxu1 }
 0x49d   :  { %v1289_v5 = vpop.f32.mrb[23].mxu0 }
 0x4f2   :  { %v794_v6 = vpop.f32.mrb[20].mxu1 }
 0x4f3   :  { %v842_v7 = vpop.f32.mrb[24].mxu0  ;;  %v1294_v8 = vpop.f32.mrb[21].mxu1 }
 0x4f4   :  { %v1365_v9 = vpack.i.bf16 %v842_v7, %v794_v6  ;;  %v1300_v10 = vpop.f32.mrb[25].mxu0  ;;  %v797_v11 = vpop.f32.mrb[22].mxu1 }
 0x4f5   :  { %v845_v12 = vpop.f32.mrb[26].mxu0  ;;  %v1295_v13 = vpop.f32.mrb[23].mxu1 }
 0x4f6   :  { %1366 = vrot.lane.b32.xlu1 %v1365_v9, %s1515_s21  ;;  %v1301_v14 = vpop.f32.mrb[27].mxu0 }
 0x4fb   :  { %v938_v16 = vpop.f32.mrb[28].mxu0 }
 0x4fc   :  { %v1312_v17 = vpop.f32.mrb[29].mxu0 }
 0x4fd   :  { %v941_v18 = vpop.f32.mrb[30].mxu0 }
 0x4fe   :  { %v1313_v28 = vpop.f32.mrb[31].mxu0 }
 0x524   :  { %v1034_v33 = vpop.f32.mrb[32].mxu0 }
 0x525   :  { %v1324_v19 = vpop.f32.mrb[33].mxu0 }
 0x526   :  { %v1037_v22 = vpop.f32.mrb[34].mxu0 }
 0x527   :  { %v890_v23 = vpop.f32.mrb[24].mxu1  ;;  %v1325_v24 = vpop.f32.mrb[35].mxu0 }
 0x528   :  { %v1370_v26 = vpack.i.bf16 %v938_v16, %v890_v23  ;;  %v1306_v27 = vpop.f32.mrb[25].mxu1 }
 0x529   :  { %v893_v30 = vpop.f32.mrb[26].mxu1 }
 0x52a   :  { %v1307_v31 = vpop.f32.mrb[27].mxu1  ;;  %1371 = vrot.lane.b32.xlu0 %v1370_v26, %s1523_s5 }
 0x52f   :  { %v986_v32 = vpop.f32.mrb[28].mxu1 }
 0x530   :  { %v1375_v35 = vpack.i.bf16 %v1034_v33, %v986_v32  ;;  %v1318_v36 = vpop.f32.mrb[29].mxu1 }
 0x531   :  { %v989_v37 = vpop.f32.mrb[30].mxu1 }
 0x532   :  { %v1319_v38 = vpop.f32.mrb[31].mxu1  ;;  %1376 = vrot.lane.b32.xlu1 %v1375_v35, %s1524_s7 }
 0x568   :  { %v1367_v0 = vpop.permute.xlu1 %1366 }
 0x569   :  { %v1369_v40 = vunpack.i.h.bf16 %v1367_v0  ;;  %v1368_v41 = vunpack.i.l.bf16 %v1367_v0 }
 0x56b   :  { %v1065_v34 = vsel %vm169_vm2, %v746_v29, %v1369_v40  ;;  %v1064_v45 = vsel %vm169_vm2, %v698_v62, %v1368_v41 }
 0x59c   :  { %v1372_v39 = vpop.permute.xlu0 %1371 }
 0x59d   :  { %v1374_v42 = vunpack.i.h.bf16 %v1372_v39  ;;  %v1373_v43 = vunpack.i.l.bf16 %v1372_v39 }
 0x59f   :  { %v1068_v48 = vsel %vm1066_vm4, %v1065_v34, %v1374_v42  ;;  %v1067_v49 = vsel %vm1066_vm4, %v1064_v45, %v1373_v43 }
 0x5a4   :  { %v1377_v44 = vpop.permute.xlu1 %1376 }
 0x5a5   :  { %v1379_v46 = vunpack.i.h.bf16 %v1377_v44  ;;  %v1378_v47 = vunpack.i.l.bf16 %v1377_v44 }
 0x5a7   :  { %v1071_v50 = vsel %vm1069_vm5, %v1068_v48, %v1379_v46  ;;  %v1070_v51 = vsel %vm1069_vm5, %v1067_v49, %v1378_v47 }
 0x5a8   :  { %v1072_v52 = vpack.c.bf16 %v1071_v50, %v1070_v51 }
 0x5aa   :  { %1331 = vmatmul.mubr.msk.bf16.vlgmr.msra.gmra.mrb[32].mxu1 %vm92_vm1, %v1072_v52 }
 0x67d   :  { %v1133_v21 = vpop.f32.mrb[32].mxu1 }
 0x67e   :  { %v1134_v54 = vadd.f32 %v1180_v20, %v1133_v21  ;;  %v1332_v53 = vpop.f32.mrb[33].mxu1 }
 0x67f   :  { %v1136_v55 = vpop.f32.mrb[34].mxu1 }
 0x680   :  { %1140 = vst.msk [vmem:[#allocation8] sm:$0xff] %vm92_vm1, %v1134_v54  ;;  %v1137_v56 = vadd.f32 %v1180_v20, %v1136_v55  ;;  %v1333_v57 = vpop.f32.mrb[35].mxu1 }
 0x682   :  { %1141 = vst.msk [vmem:[#allocation8 + $0x8] sm:$0xff] %vm92_vm1, %v1137_v56 }
 0x683   :  { %1493 = shalt.err (!%p1490_p0)
}
 0x684   :  { %s1494_s25 = scalar_lea.hbm %s1825_s6, 256 }
 0x685   :  { %p1495_p1 = scmp.ne.s32.totalorder %s1825_s6, %s1494_s25  ;;  %p1498_p2 = scmp.lt.u32.totalorder %s1494_s25, %s1825_s6 }
 0x687   :  { %p1500_p3 = pnand %p1498_p2, %p1495_p1 }
 0x689   :  { %1503 = shalt.err (!%p1500_p3)
}
 0x68a   :  { %1153 = dma.vmem_to_hbm [thread:$0]  %s1148_s22, 256, %s1825_s6, [#allocation4], %s1514_s1, %s1514_s1, %s1515_s21  }
 0x68b   :  { %1508 = dma.done.wait [#allocation4], 256  }
 0x68c   :  { %1509 = vsyncadd [#allocation4], 4294967040 }
 0x68d   :  { %1157 = vsyncpa [#allocation3], 1 }
 0x68e   :  { %1158 = vsyncpa [#allocation6], 1 }
 0x68f   :  { %1159 = vsyncpa [#allocation4], 1 }

</bundles_post_ra>
